<compile_context>
chip_gen: v6e
topology: v6e:2x2x1
jax: 0.10.0
libtpu: 0.0.40
codegen_flags: <defaults>
</compile_context>

<pallas_src>
import math

import jax
import jax.numpy as jnp
from jax.experimental import pallas as pl
from jax.experimental.pallas import tpu as pltpu

IN_FEATURES = 28 * 28   # 784, matches mnist.data[0].numel()
HIDDEN = 128
OUT_FEATURES = 10
OUT_PAD = 128           # lane-dense padded logit width
NEG_BIG = -1e30         # bias for padded logit columns
TM_CAP = 512            # batch-tile cap (VMEM-safe on v5e/v6e/v7x, ~85% roofline)
MIN_TILE = 16           # bf16 native sublane tile height
SMALL_BATCH = 128       # below this, skip Pallas (XLA fused path is faster)
BATCH = 8


def mlp_logsoftmax_kernel(x_ref, w1_ref, b1_ref, w2_ref, b2_ref, o_ref):
    # In-kernel f32 -> bf16 cast of the activations (cheap VPU work, hidden
    # under the DMA); MXU matmuls accumulate in f32.
    x = x_ref[...].astype(jnp.bfloat16)
    h = jnp.dot(x, w1_ref[...], preferred_element_type=jnp.float32)
    # Bias + ReLU in f32 on the VPU.
    h = jnp.maximum(h + b1_ref[...], 0.0)
    # Second linear: re-cast activations to bf16 for the MXU, accumulate f32.
    logits = jnp.dot(h.astype(jnp.bfloat16), w2_ref[...],
                     preferred_element_type=jnp.float32)
    logits = logits + b2_ref[...]   # padded columns get -1e30 here
    # Numerically stable log_softmax over the 128-wide padded logits, all f32.
    m = jnp.max(logits, axis=1, keepdims=True)
    shifted = logits - m
    lse = jnp.log(jnp.sum(jnp.exp(shifted), axis=1, keepdims=True))
    o_ref[...] = (shifted - lse).astype(o_ref.dtype)


def _round_up(n, m):
    return ((n + m - 1) // m) * m


def _cdiv(a, b):
    return (a + b - 1) // b


def _choose_tm(b):
    """Batch-tile height: <= TM_CAP, multiple of 16, >=2 grid steps when the
    batch is big enough (so v7x's second TensorCore gets work), and sized to
    minimize pad rows on ragged batches."""
    b16 = _round_up(b, MIN_TILE)
    n_tiles = _cdiv(b16, TM_CAP)
    if n_tiles == 1 and b16 >= 2 * MIN_TILE:
        n_tiles = 2
    return min(TM_CAP, _round_up(_cdiv(b16, n_tiles), MIN_TILE))


def model_forward(x, w1_t, b1, w2_t, b2, *, force_pallas=False):
    """x: [B, 1, 28, 28] (anything flattening to [B, 784]). Returns [B, 10] f32."""
    xf = x.reshape(-1, IN_FEATURES).astype(jnp.float32)
    b = xf.shape[0]

    if b < SMALL_BATCH and not force_pallas:
        # Small-batch fast path: Pallas launch + padding would dominate.
        h = jnp.maximum(xf @ w1_t.astype(jnp.float32) + b1.reshape(1, -1), 0.0)
        logits = h @ w2_t.astype(jnp.float32) + b2.reshape(1, -1)
        return jax.nn.log_softmax(logits, axis=1)

    tm = _choose_tm(b)
    n_grid = _cdiv(b, tm)
    b_pad = tm * n_grid
    if b_pad != b:
        # Row-only f32 pad for the ragged remainder (no dtype / K padding).
        xf = jnp.pad(xf, ((0, b_pad - b), (0, 0)))

    # Resident weights: bf16 MXU operands. W2 zero-padded to 128 output cols.
    w1_p = w1_t.astype(jnp.bfloat16)                                  # [784, 128]
    w2_p = jnp.zeros((HIDDEN, OUT_PAD), jnp.bfloat16)
    w2_p = w2_p.at[:, :OUT_FEATURES].set(w2_t.astype(jnp.bfloat16))   # [128, 128]

    # Biases stay f32. Padded logit columns get a huge negative bias so they
    # never perturb the row max or the logsumexp.
    b1_p = b1.reshape(1, HIDDEN).astype(jnp.float32)
    b2_p = jnp.full((1, OUT_PAD), NEG_BIG, jnp.float32)
    b2_p = b2_p.at[0, :OUT_FEATURES].set(b2.reshape(-1).astype(jnp.float32))

    out_padded = pl.pallas_call(
        mlp_logsoftmax_kernel,
        out_shape=jax.ShapeDtypeStruct((b_pad, OUT_PAD), jnp.bfloat16),
        grid_spec=pltpu.PrefetchScalarGridSpec(
            num_scalar_prefetch=0,
            grid=(n_grid,),
            in_specs=[
                # Activations: f32, tiled over batch; K=784 is the full dim
                # (exempt from the 128-multiple rule), cast to bf16 in-kernel.
                pl.BlockSpec((tm, IN_FEATURES), lambda i: (i, 0)),
                # Weights / biases: VMEM-resident (constant index_map).
                # (Could add pipeline_mode=pl.Buffered(1) to drop the unused
                # double buffer; left at default for lowering safety.)
                pl.BlockSpec((IN_FEATURES, HIDDEN), lambda i: (0, 0)),
                pl.BlockSpec((1, HIDDEN), lambda i: (0, 0)),
                pl.BlockSpec((HIDDEN, OUT_PAD), lambda i: (0, 0)),
                pl.BlockSpec((1, OUT_PAD), lambda i: (0, 0)),
            ],
            out_specs=pl.BlockSpec((tm, OUT_PAD), lambda i: (i, 0)),
        ),
        compiler_params=pltpu.CompilerParams(
            dimension_semantics=("parallel",),   # v7x: shard batch tiles across 2 TCs
        ),
    )(xf, w1_p, b1_p, w2_p, b2_p)

    return out_padded[:b, :OUT_FEATURES].astype(jnp.float32)


def xavier_uniform(key, fan_in, fan_out):
    # Matches torch.nn.init.xavier_uniform_ on a [fan_out, fan_in] weight.
    bound = math.sqrt(6.0 / (fan_in + fan_out))
    w = jax.random.uniform(key, (fan_out, fan_in), jnp.float32, -bound, bound)
    return w.T  # kernel uses [fan_in, fan_out]


def reference_forward(x, w1_t, b1, w2_t, b2):
    xf = x.reshape(-1, IN_FEATURES).astype(jnp.float32)
    h = jnp.maximum(xf @ w1_t + b1.reshape(1, -1), 0.0)
    logits = h @ w2_t + b2.reshape(1, -1)
    return jax.nn.log_softmax(logits, axis=1)


def _check(out, ref, batch):
    assert out.shape == (batch, OUT_FEATURES)
    assert bool(jnp.all(jnp.isfinite(out)))
    # log_softmax rows should sum (in prob space) to ~1 (bf16 output slab).
    row_prob_sums = jnp.sum(jnp.exp(out), axis=1)
    assert bool(jnp.all(jnp.abs(row_prob_sums - 1.0) < 3e-2))
    # Loose tolerance vs. f32 reference (bf16 MXU operands + bf16 writeback).
    max_diff = float(jnp.max(jnp.abs(out - ref)))
    assert max_diff < 0.1, f"max diff vs reference too large: {max_diff}"


if __name__ == "__main__":
    key = jax.random.PRNGKey(0)
    kx, kx2, k1, k2 = jax.random.split(key, 4)

    # Deterministic parameters (shapes from the module __init__).
    w1_t = xavier_uniform(k1, IN_FEATURES, HIDDEN)      # [784, 128]
    b1 = jnp.zeros((1, HIDDEN), jnp.float32)            # zeros, as in init
    w2_t = xavier_uniform(k2, HIDDEN, OUT_FEATURES)     # [128, 10]
    b2 = jnp.zeros((1, OUT_FEATURES), jnp.float32)

    # Small deterministic image-like NCHW input; force the Pallas path so the
    # kernel itself is exercised at this size.
    x = jax.random.uniform(kx, (BATCH, 1, 28, 28), jnp.float32)
    out = jax.block_until_ready(model_forward(x, w1_t, b1, w2_t, b2,
                                              force_pallas=True))
    _check(out, reference_forward(x, w1_t, b1, w2_t, b2), BATCH)

    # Larger ragged batch: multi-step parallel grid + remainder-pad path.
    B2 = 600
    x2 = jax.random.uniform(kx2, (B2, 1, 28, 28), jnp.float32)
    out2 = jax.block_until_ready(model_forward(x2, w1_t, b1, w2_t, b2))
    _check(out2, reference_forward(x2, w1_t, b1, w2_t, b2), B2)

    print("KERNEL_OK")
</pallas_src>

<mosaic_0001>
module attributes {stable_mosaic.version = 11 : i64} {
  func.func @mlp_logsoftmax_kernel(%arg0: i32, %arg1: memref<16x784xf32, #tpu.memory_space<vmem>>, %arg2: memref<784x128xbf16, #tpu.memory_space<vmem>>, %arg3: memref<1x128xf32, #tpu.memory_space<vmem>>, %arg4: memref<128x128xbf16, #tpu.memory_space<vmem>>, %arg5: memref<1x128xf32, #tpu.memory_space<vmem>>, %arg6: memref<16x128xbf16, #tpu.memory_space<vmem>>) attributes {dimension_semantics = [#tpu.dimension_semantics<parallel>], iteration_bounds = array<i64: 1>, scalar_prefetch = 0 : i64, scratch_operands = 0 : i64, tpu.core_type = #tpu.core_type<tc>, window_params = [{transform_indices = @transform_0, window_bounds = array<i64: 16, 784>}, {pipeline_mode = #tpu.pipeline_mode<synchronous>, transform_indices = @transform_1, window_bounds = array<i64: 784, 128>}, {pipeline_mode = #tpu.pipeline_mode<synchronous>, transform_indices = @transform_2, window_bounds = array<i64: 1, 128>}, {pipeline_mode = #tpu.pipeline_mode<synchronous>, transform_indices = @transform_3, window_bounds = array<i64: 128, 128>}, {pipeline_mode = #tpu.pipeline_mode<synchronous>, transform_indices = @transform_4, window_bounds = array<i64: 1, 128>}, {transform_indices = @transform_5, window_bounds = array<i64: 16, 128>}]} {
    %c0 = arith.constant 0 : index
    %c0_0 = arith.constant 0 : index
    %0 = vector.load %arg1[%c0, %c0_0] : memref<16x784xf32, #tpu.memory_space<vmem>>, vector<16x784xf32>
    %1 = arith.truncf %0 : vector<16x784xf32> to vector<16x784xbf16>
    %c0_1 = arith.constant 0 : index
    %c0_2 = arith.constant 0 : index
    %2 = vector.load %arg2[%c0_1, %c0_2] : memref<784x128xbf16, #tpu.memory_space<vmem>>, vector<784x128xbf16>
    %cst = arith.constant dense<0.000000e+00> : vector<16x128xf32>
    %3 = tpu.matmul %1, %2, %cst {dimension_numbers = #tpu.dot_dimension_numbers<[1], [0], [0], [1], [0, 0, 1, 1], [], []>} : vector<16x784xbf16>, vector<784x128xbf16>, vector<16x128xf32> -> vector<16x128xf32>
    %c0_3 = arith.constant 0 : index
    %c0_4 = arith.constant 0 : index
    %4 = vector.load %arg3[%c0_3, %c0_4] : memref<1x128xf32, #tpu.memory_space<vmem>>, vector<1x128xf32>
    %5 = vector.broadcast %4 : vector<1x128xf32> to vector<16x128xf32>
    %6 = arith.addf %3, %5 : vector<16x128xf32>
    %cst_5 = arith.constant 0.000000e+00 : f32
    %7 = vector.broadcast %cst_5 : f32 to vector<16x128xf32>
    %8 = arith.maximumf %6, %7 : vector<16x128xf32>
    %9 = arith.truncf %8 : vector<16x128xf32> to vector<16x128xbf16>
    %c0_6 = arith.constant 0 : index
    %c0_7 = arith.constant 0 : index
    %10 = vector.load %arg4[%c0_6, %c0_7] : memref<128x128xbf16, #tpu.memory_space<vmem>>, vector<128x128xbf16>
    %cst_8 = arith.constant dense<0.000000e+00> : vector<16x128xf32>
    %11 = tpu.matmul %9, %10, %cst_8 {dimension_numbers = #tpu.dot_dimension_numbers<[1], [0], [0], [1], [0, 0, 1, 1], [], []>} : vector<16x128xbf16>, vector<128x128xbf16>, vector<16x128xf32> -> vector<16x128xf32>
    %c0_9 = arith.constant 0 : index
    %c0_10 = arith.constant 0 : index
    %12 = vector.load %arg5[%c0_9, %c0_10] : memref<1x128xf32, #tpu.memory_space<vmem>>, vector<1x128xf32>
    %13 = vector.broadcast %12 : vector<1x128xf32> to vector<16x128xf32>
    %14 = arith.addf %11, %13 : vector<16x128xf32>
    %cst_11 = arith.constant dense<0xFF800000> : vector<16xf32>
    %15 = vector.multi_reduction <maximumf>, %14, %cst_11 [1] : vector<16x128xf32> to vector<16xf32>
    %16 = vector.shape_cast %15 : vector<16xf32> to vector<16x1xf32>
    %17 = vector.broadcast %16 : vector<16x1xf32> to vector<16x128xf32>
    %18 = arith.subf %14, %17 : vector<16x128xf32>
    %19 = math.exp %18 : vector<16x128xf32>
    %cst_12 = arith.constant dense<0.000000e+00> : vector<16xf32>
    %20 = vector.multi_reduction <add>, %19, %cst_12 [1] : vector<16x128xf32> to vector<16xf32>
    %21 = vector.shape_cast %20 : vector<16xf32> to vector<16x1xf32>
    %22 = math.log %21 : vector<16x1xf32>
    %23 = vector.broadcast %22 : vector<16x1xf32> to vector<16x128xf32>
    %24 = arith.subf %18, %23 : vector<16x128xf32>
    %25 = arith.truncf %24 : vector<16x128xf32> to vector<16x128xbf16>
    %c0_13 = arith.constant 0 : index
    %c0_14 = arith.constant 0 : index
    %26 = vector.load %arg6[%c0_13, %c0_14] : memref<16x128xbf16, #tpu.memory_space<vmem>>, vector<16x128xbf16>
    tpu.vector_store %arg6[%c0_13, %c0_14], %25 {strides = array<i32>} : memref<16x128xbf16, #tpu.memory_space<vmem>>, vector<16x128xbf16>,
    return
  }
  func.func @transform_0(%arg0: i32) -> (i32, i32) {
    %c0_i32 = arith.constant 0 : i32
    %c0_i32_0 = arith.constant 0 : i32
    return %arg0, %c0_i32 : i32, i32
  }
  func.func @transform_1(%arg0: i32) -> (i32, i32) {
    %c0_i32 = arith.constant 0 : i32
    %c0_i32_0 = arith.constant 0 : i32
    %c0_i32_1 = arith.constant 0 : i32
    return %c0_i32, %c0_i32_0 : i32, i32
  }
  func.func @transform_2(%arg0: i32) -> (i32, i32) {
    %c0_i32 = arith.constant 0 : i32
    %c0_i32_0 = arith.constant 0 : i32
    %c0_i32_1 = arith.constant 0 : i32
    return %c0_i32, %c0_i32_0 : i32, i32
  }
  func.func @transform_3(%arg0: i32) -> (i32, i32) {
    %c0_i32 = arith.constant 0 : i32
    %c0_i32_0 = arith.constant 0 : i32
    %c0_i32_1 = arith.constant 0 : i32
    return %c0_i32, %c0_i32_0 : i32, i32
  }
  func.func @transform_4(%arg0: i32) -> (i32, i32) {
    %c0_i32 = arith.constant 0 : i32
    %c0_i32_0 = arith.constant 0 : i32
    %c0_i32_1 = arith.constant 0 : i32
    return %c0_i32, %c0_i32_0 : i32, i32
  }
  func.func @transform_5(%arg0: i32) -> (i32, i32) {
    %c0_i32 = arith.constant 0 : i32
    %c0_i32_0 = arith.constant 0 : i32
    return %arg0, %c0_i32 : i32, i32
  }
}

</mosaic_0001>

<bundles_post_ra>
// kernel: tpu_custom_call.1
= control target key start
LH: loop header
LB: loop body
LE: loop exit
PB: predicated region body
PF: predicated region fallthrough
CT: control target
= control target key end

     0   :  { %10 = vsyncpa [#allocation3], 0  ;;  %s1227_s0 = inlined_call_operand.hbm [shape: f32[16,784], index: 0, kind: input, shape index: {}]   ;;  %s1228_s1 = inlined_call_operand.hbm [shape: bf16[784,128], index: 1, kind: input, shape index: {}]   ;;  %s1229_s2 = inlined_call_operand.vmem [shape: f32[1,128], index: 2, kind: input, shape index: {}]   ;;  %s1230_s3 = inlined_call_operand.hbm [shape: bf16[128,128], index: 3, kind: input, shape index: {}]   ;;  %s1231_s4 = inlined_call_operand.vmem [shape: f32[1,128], index: 4, kind: input, shape index: {}]   ;;  %s1232_s5 = inlined_call_operand.hbm [shape: bf16[16,128], index: 5, kind: output, shape index: {}]  }
   0x1   :  { %11 = vsyncpa [#allocation6], 0 }
   0x2   :  { %12 = vsyncpa [#allocation4], 0  ;;  %s1147_s18 = smov [#allocation5]  }
   0x3   :  { %s30_s19 = sshll.u32 %s1147_s18, 4  ;;  %s31_s19 = int_to_ptr.vmem [resolvable:$true] %s30_s19 }
   0x4   :  { %s1069_s20 = scalar_lea.vmem %s31_s19, 6272  ;;  %p1074_p1 = scmp.lt.s32.totalorder %s31_s19, %s31_s19 }
   0x5   :  { %p1070_p0 = scmp.ne.s32.totalorder %s31_s19, %s1069_s20  ;;  %p1075_p2 = scmp.lt.s32.totalorder %s1069_s20, %s1069_s20 }
   0x7   :  { %p1076_p3 = por %p1075_p2, %p1074_p1 }
   0x9   :  { %p1077_p4 = pnand %p1076_p3, %p1070_p0 }
   0xb   :  { %1080 = shalt.err (!%p1077_p4)
}
   0xc   :  { %s1148_s21 = smov 64   ;;  %s1149_s22 = smov 4  }
   0xd   :  { %36 = dma.hbm_to_vmem [thread:$0]  %s1228_s1, 6272, %s31_s19, [#allocation6], %s1148_s21, %s1148_s21, %s1149_s22  }
   0xe   :  { %s1150_s25 = smov [#allocation2]  }
   0xf   :  { %s18_s26 = sshll.u32 %s1150_s25, 4  ;;  %s19_s26 = int_to_ptr.vmem [resolvable:$true] %s18_s26 }
  0x10   :  { %s1089_s27 = scalar_lea.vmem %s19_s26, 1792  ;;  %p1094_p6 = scmp.lt.s32.totalorder %s19_s26, %s19_s26 }
  0x11   :  { %p1090_p5 = scmp.ne.s32.totalorder %s19_s26, %s1089_s27  ;;  %p1095_p7 = scmp.lt.s32.totalorder %s1089_s27, %s1089_s27 }
  0x13   :  { %p1096_p8 = por %p1095_p7, %p1094_p6 }
  0x15   :  { %p1097_p9 = pnand %p1096_p8, %p1090_p5 }
  0x17   :  { %1100 = shalt.err (!%p1097_p9)
}
  0x18   :  { %s1151_s28 = smov 896   ;;  %s1152_s29 = smov 56  }
  0x19   :  { %24 = dma.hbm_to_vmem [thread:$0]  %s1227_s0, 1792, %s19_s26, [#allocation3], %s1151_s28, %s1151_s28, %s1152_s29  }
  0x1a   :  { %s1153_s7 = smov [#allocation7]  }
  0x1b   :  { %s44_s8 = sshll.u32 %s1153_s7, 4  ;;  %s45_s8 = int_to_ptr.vmem [resolvable:$true] %s44_s8 }
  0x1c   :  { %s1109_s1 = scalar_lea.vmem %s45_s8, 1024  ;;  %p1114_p11 = scmp.lt.s32.totalorder %s45_s8, %s45_s8 }
  0x1d   :  { %p1110_p10 = scmp.ne.s32.totalorder %s45_s8, %s1109_s1  ;;  %p1115_p12 = scmp.lt.s32.totalorder %s1109_s1, %s1109_s1 }
  0x1f   :  { %p1116_p13 = por %p1115_p12, %p1114_p11 }
  0x21   :  { %p1117_p0 = pnand %p1116_p13, %p1110_p10 }
  0x23   :  { %1120 = shalt.err (!%p1117_p0)
}
  0x24   :  { %50 = dma.hbm_to_vmem [thread:$0]  %s1230_s3, 1024, %s45_s8, [#allocation6], %s1148_s21, %s1148_s21, %s1149_s22  }
  0x25   :  { %1141 = dma.done.wait [#allocation3], 1792  }
  0x26   :  { %1142 = vsyncadd [#allocation3], 4294965504 }
  0x27   :  { %1143 = dma.done.wait [#allocation6], 7296  }
  0x28   :  { %1144 = vsyncadd [#allocation6], 4294960000  ;;  %v996_v0 = vld [vmem:[#allocation5 + $0x78] sm:$0xff]   ;;  %v1000_v4 = vld [vmem:[#allocation5 + $0x70] sm:$0xff]   ;;  %v1154_v43 = vmov 0.0   ;;  %vm1155_vm0 = vmmov 0  }
  0x29   :  { %v997_v1 = vld [vmem:[#allocation5 + $0x38] sm:$0xff]   ;;  %883 = vmatprep.subr.bf16.mxu0 %v996_v0  ;;  %v1001_v5 = vld [vmem:[#allocation5 + $0x30] sm:$0xff]   ;;  %v1004_v8 = vld [vmem:[#allocation5 + $0x68] sm:$0xff]   ;;  %vm483_vm1 = vcmask 130048  }
  0x2a   :  { %v998_v2 = vld [vmem:[#allocation5 + $0xf8] sm:$0xff]   ;;  %884 = vmatpush3.bf16.msra.mxu0 %v997_v1  ;;  %v1002_v6 = vld [vmem:[#allocation5 + $0xf0] sm:$0xff]   ;;  %v1005_v9 = vld [vmem:[#allocation5 + $0x28] sm:$0xff]  }
  0x2b   :  { %v999_v3 = vld [vmem:[#allocation5 + $0xb8] sm:$0xff]   ;;  %905 = vmatprep.subr.bf16.mxu1 %v998_v2  ;;  %885 = vmatprep.subr.bf16.mxu0 %v1000_v4  ;;  %v1003_v7 = vld [vmem:[#allocation5 + $0xb0] sm:$0xff]   ;;  %v1006_v10 = vld [vmem:[#allocation5 + $0xe8] sm:$0xff]  }
  0x2c   :  { %906 = vmatpush3.bf16.msra.mxu1 %v999_v3  ;;  %v1007_v11 = vld [vmem:[#allocation5 + $0xa8] sm:$0xff]   ;;  %v1008_v12 = vld [vmem:[#allocation5 + $0x60] sm:$0xff]   ;;  %v1012_v16 = vld [vmem:[#allocation5 + $0x58] sm:$0xff]  }
  0x2d   :  { %907 = vmatprep.subr.bf16.mxu1 %v1002_v6  ;;  %v1009_v13 = vld [vmem:[#allocation5 + $0x20] sm:$0xff]   ;;  %v1013_v17 = vld [vmem:[#allocation5 + $0x18] sm:$0xff]   ;;  %v1016_v20 = vld [vmem:[#allocation5 + $0x50] sm:$0xff]  }
  0x2e   :  { %886 = vmatpush3.bf16.msra.mxu0 %v1001_v5  ;;  %v1010_v14 = vld [vmem:[#allocation5 + $0xe0] sm:$0xff]   ;;  %v1014_v18 = vld [vmem:[#allocation5 + $0xd8] sm:$0xff]   ;;  %v1017_v21 = vld [vmem:[#allocation5 + $0x10] sm:$0xff]  }
  0x2f   :  { %887 = vmatprep.subr.bf16.mxu0 %v1004_v8  ;;  %v1011_v15 = vld [vmem:[#allocation5 + $0xa0] sm:$0xff]   ;;  %v1015_v19 = vld [vmem:[#allocation5 + $0x98] sm:$0xff]   ;;  %v1018_v22 = vld [vmem:[#allocation5 + $0xd0] sm:$0xff]  }
  0x30   :  { %908 = vmatpush3.bf16.msra.mxu1 %v1003_v7  ;;  %v1019_v23 = vld [vmem:[#allocation5 + $0x90] sm:$0xff]   ;;  %v1020_v24 = vld [vmem:[#allocation5 + $0x48] sm:$0xff]   ;;  %v1024_v28 = vld [vmem:[#allocation5 + $0x40] sm:$0xff]  }
  0x31   :  { %909 = vmatprep.subr.bf16.mxu1 %v1006_v10  ;;  %v1021_v25 = vld [vmem:[#allocation5 + $0x8] sm:$0xff]   ;;  %v1025_v29 = vld [vmem:[#allocation5] sm:$0xff]   ;;  %v64_v31 = vld [vmem:[#allocation2 + $0x8] sm:$0xff] }
  0x32   :  { %888 = vmatpush3.bf16.msra.mxu0 %v1005_v9  ;;  %v1022_v26 = vld [vmem:[#allocation5 + $0xc8] sm:$0xff]   ;;  %v1026_v30 = vld [vmem:[#allocation5 + $0xc0] sm:$0xff]   ;;  %v71_v32 = vld [vmem:[#allocation2 + $0x40] sm:$0xff] }
  0x33   :  { %889 = vmatprep.subr.bf16.mxu0 %v1008_v12  ;;  %v1023_v27 = vld [vmem:[#allocation5 + $0x88] sm:$0xff]   ;;  %v78_v33 = vpack.c.bf16 %v71_v32, %v64_v31  ;;  %v1027_v34 = vld [vmem:[#allocation5 + $0x80] sm:$0xff]   ;;  %v63_v35 = vld [vmem:[#allocation2] sm:$0xff] }
  0x34   :  { %910 = vmatpush3.bf16.msra.mxu1 %v1007_v11  ;;  %v70_v36 = vld [vmem:[#allocation2 + $0x38] sm:$0xff]  ;;  %v1028_v38 = vld [vmem:[#allocation5 + $0x178] sm:$0xff]   ;;  %v73_v40 = vld [vmem:[#allocation2 + $0x50] sm:$0xff] }
  0x35   :  { %911 = vmatprep.subr.bf16.mxu1 %v1010_v14  ;;  %519 = vmatprep.mubr.bf16.mxu0 %v78_v33  ;;  %v77_v37 = vpack.c.bf16 %v70_v36, %v63_v35  ;;  %v66_v39 = vld [vmem:[#allocation2 + $0x18] sm:$0xff]  ;;  %v1029_v42 = vld [vmem:[#allocation5 + $0x138] sm:$0xff]   ;;  %v65_v44 = vld [vmem:[#allocation2 + $0x10] sm:$0xff] }
  0x36   :  { %890 = vmatpush3.bf16.msra.mxu0 %v1009_v13  ;;  %v80_v41 = vpack.c.bf16 %v73_v40, %v66_v39  ;;  %v72_v45 = vld [vmem:[#allocation2 + $0x48] sm:$0xff]  ;;  %v1030_v47 = vld [vmem:[#allocation5 + $0x170] sm:$0xff]   ;;  %v1032_v49 = vld [vmem:[#allocation5 + $0x168] sm:$0xff]  }
  0x37   :  { %891 = vmatprep.subr.bf16.mxu0 %v1012_v16  ;;  %v79_v46 = vpack.c.bf16 %v72_v45, %v65_v44  ;;  %v1031_v48 = vld [vmem:[#allocation5 + $0x130] sm:$0xff]   ;;  %v1033_v50 = vld [vmem:[#allocation5 + $0x128] sm:$0xff]   ;;  %v1034_v51 = vld [vmem:[#allocation5 + $0x160] sm:$0xff]  }
  0x38   :  { %912 = vmatpush3.bf16.msra.mxu1 %v1011_v15  ;;  %560 = vmatprep.mubr.bf16.mxu1 %v80_v41  ;;  %v1035_v52 = vld [vmem:[#allocation5 + $0x120] sm:$0xff]   ;;  %v1036_v53 = vld [vmem:[#allocation5 + $0x158] sm:$0xff]   ;;  %v1038_v55 = vld [vmem:[#allocation5 + $0x150] sm:$0xff]  }
  0x39   :  { %913 = vmatprep.subr.bf16.mxu1 %v1014_v18  ;;  %v1037_v54 = vld [vmem:[#allocation5 + $0x118] sm:$0xff]   ;;  %v1044_v56 = vld [vmem:[#allocation5 + $0x180] sm:$0xff]   ;;  %v1039_v58 = vld [vmem:[#allocation5 + $0x110] sm:$0xff]  }
  0x3a   :  { %892 = vmatpush3.bf16.msra.mxu0 %v1013_v17  ;;  %v68_v57 = vld [vmem:[#allocation2 + $0x28] sm:$0xff]  ;;  %v1040_v59 = vld [vmem:[#allocation5 + $0x148] sm:$0xff]   ;;  %v75_v60 = vld [vmem:[#allocation2 + $0x60] sm:$0xff] }
  0x3b   :  { %893 = vmatprep.subr.bf16.mxu0 %v1016_v20  ;;  %v82_v61 = vpack.c.bf16 %v75_v60, %v68_v57  ;;  %v69_v62 = vld [vmem:[#allocation2 + $0x30] sm:$0xff]  ;;  %v76_v63 = vld [vmem:[#allocation2 + $0x68] sm:$0xff]  ;;  %v1041_v1 = vld [vmem:[#allocation5 + $0x108] sm:$0xff]  }
  0x3c   :  { %914 = vmatpush3.bf16.msra.mxu1 %v1015_v19  ;;  %v83_v0 = vpack.c.bf16 %v76_v63, %v69_v62  ;;  %v1042_v2 = vld [vmem:[#allocation5 + $0x140] sm:$0xff]   ;;  %v67_v4 = vld [vmem:[#allocation2 + $0x20] sm:$0xff]  ;;  %v74_v5 = vld [vmem:[#allocation2 + $0x58] sm:$0xff] }
  0x3d   :  { %915 = vmatprep.subr.bf16.mxu1 %v1018_v22  ;;  %v1043_v3 = vld [vmem:[#allocation5 + $0x100] sm:$0xff]   ;;  %v81_v6 = vpack.c.bf16 %v74_v5, %v67_v4  ;;  %v1046_v8 = vld [vmem:[#allocation7 + $0x30] sm:$0xff]   ;;  %v1047_v9 = vld [vmem:[#allocation7 + $0x28] sm:$0xff]  }
  0x3e   :  { %894 = vmatpush3.bf16.msra.mxu0 %v1017_v21  ;;  %v1045_v7 = vld [vmem:[#allocation7 + $0x38] sm:$0xff]   ;;  %v1048_v10 = vld [vmem:[#allocation7 + $0x20] sm:$0xff]   ;;  %v1050_v12 = vld [vmem:[#allocation7 + $0x10] sm:$0xff]  }
  0x3f   :  { %895 = vmatprep.subr.bf16.mxu0 %v1020_v24  ;;  %v1049_v11 = vld [vmem:[#allocation7 + $0x18] sm:$0xff]   ;;  %v1051_v13 = vld [vmem:[#allocation7 + $0x8] sm:$0xff]   ;;  %v1052_v14 = vld [vmem:[#allocation7] sm:$0xff]  }
  0x40   :  { %916 = vmatpush3.bf16.msra.mxu1 %v1019_v23 }
  0x41   :  { %917 = vmatprep.subr.bf16.mxu1 %v1022_v26 }
  0x42   :  { %896 = vmatpush3.bf16.msra.mxu0 %v1021_v25 }
  0x43   :  { %897 = vmatprep.subr.bf16.mxu0 %v1024_v28 }
  0x44   :  { %918 = vmatpush3.bf16.msra.mxu1 %v1023_v27  ;;  %v814_v27 = vld [vmem:[%s1229_s2] ss:$0 sm:$0xff] }
  0x45   :  { %919 = vmatprep.subr.bf16.mxu1 %v1026_v30 }
  0x46   :  { %898 = vmatpush3.bf16.msra.mxu0 %v1025_v29 }
  0x47   :  { %927 = vmatprep.subr.bf16.mxu0 %v1028_v38 }
  0x48   :  { %920 = vmatpush3.bf16.msra.mxu1 %v1027_v34 }
  0x49   :  { %960 = vmatprep.subr.bf16.mxu1 %v1154_v43  ;;  %520 = vmatmul.mubr.bf16.vlgmr.msra.gmra.mxu0 %v77_v37 }
  0x4a   :  { %928 = vmatpush3.bf16.msra.mxu0 %v1029_v42  ;;  %601 = vmatprep.mubr.bf16.mxu0 %v82_v61 }
  0x4b   :  { %561 = vmatmul.mubr.bf16.vlgmr.msra.gmra.mxu1 %v79_v46  ;;  %929 = vmatprep.subr.bf16.mxu0 %v1030_v47 }
  0x4c   :  { %962 = vmatprep.mubr.msk.bf16.mxu1 %vm1155_vm0, %v1154_v43  ;;  %961 = vmatpush3.bf16.msra.mxu1 %v1044_v56 }
  0x4d   :  { %966 = vmatprep.subr.bf16.mxu1 %v1154_v43 }
  0x4e   :  { %930 = vmatpush3.bf16.msra.mxu0 %v1031_v48 }
  0x4f   :  { %931 = vmatprep.subr.bf16.mxu0 %v1032_v49  ;;  %v865_v49 = vld [vmem:[%s1231_s4] ss:$0 sm:$0xff]  ;;  %s1156_s4 = smov [#allocation8]  }
  0x50   :  { %s801_s12 = sshll.u32 %s1156_s4, 4  ;;  %s802_s12 = int_to_ptr.vmem [resolvable:$true] %s801_s12 }
  0x51   :  { %s1121_s13 = scalar_lea.vmem %s802_s12, 128  ;;  %p1126_p2 = scmp.lt.s32.totalorder %s802_s12, %s802_s12 }
  0x52   :  { %932 = vmatpush3.bf16.msra.mxu0 %v1033_v50  ;;  %p1122_p1 = scmp.ne.s32.totalorder %s802_s12, %s1121_s13  ;;  %p1127_p3 = scmp.lt.s32.totalorder %s1121_s13, %s1121_s13 }
  0x53   :  { %933 = vmatprep.subr.bf16.mxu0 %v1034_v51  ;;  %963 = vmatmul.mubr.msk.bf16.vlgmr.msra.gmra.mxu1 %vm483_vm1, %v83_v0 }
  0x54   :  { %982 = vmatprep.mubr.msk.bf16.mxu1 %vm1155_vm0, %v1154_v43  ;;  %967 = vmatpush3.bf16.msra.mxu1 %v1045_v7  ;;  %p1128_p4 = por %p1127_p3, %p1126_p2 }
  0x55   :  { %968 = vmatprep.subr.bf16.mxu1 %v1154_v43 }
  0x56   :  { %934 = vmatpush3.bf16.msra.mxu0 %v1035_v52  ;;  %p1129_p5 = pnand %p1128_p4, %p1122_p1 }
  0x57   :  { %935 = vmatprep.subr.bf16.mxu0 %v1036_v53 }
  0x58   :  { %969 = vmatpush3.bf16.msra.mxu1 %v1046_v8 }
  0x59   :  { %970 = vmatprep.subr.bf16.mxu1 %v1154_v43 }
  0x5a   :  { %936 = vmatpush3.bf16.msra.mxu0 %v1037_v54 }
  0x5b   :  { %937 = vmatprep.subr.bf16.mxu0 %v1038_v55 }
  0x5c   :  { %971 = vmatpush3.bf16.msra.mxu1 %v1047_v9 }
  0x5d   :  { %972 = vmatprep.subr.bf16.mxu1 %v1154_v43 }
  0x5e   :  { %938 = vmatpush3.bf16.msra.mxu0 %v1039_v58 }
  0x5f   :  { %939 = vmatprep.subr.bf16.mxu0 %v1040_v59 }
  0x60   :  { %973 = vmatpush3.bf16.msra.mxu1 %v1048_v10 }
  0x61   :  { %974 = vmatprep.subr.bf16.mxu1 %v1154_v43 }
  0x62   :  { %940 = vmatpush3.bf16.msra.mxu0 %v1041_v1 }
  0x63   :  { %941 = vmatprep.subr.bf16.mxu0 %v1042_v2 }
  0x64   :  { %975 = vmatpush3.bf16.msra.mxu1 %v1049_v11 }
  0x65   :  { %976 = vmatprep.subr.bf16.mxu1 %v1154_v43 }
  0x66   :  { %942 = vmatpush3.bf16.msra.mxu0 %v1043_v3 }
  0x68   :  { %977 = vmatpush3.bf16.msra.mxu1 %v1050_v12 }
  0x69   :  { %602 = vmatmul.mubr.bf16.vlgmr.msra.gmra.mxu0 %v81_v6  ;;  %978 = vmatprep.subr.bf16.mxu1 %v1154_v43 }
  0x6c   :  { %979 = vmatpush3.bf16.msra.mxu1 %v1051_v13 }
  0x6d   :  { %980 = vmatprep.subr.bf16.mxu1 %v1154_v43 }
  0x70   :  { %981 = vmatpush3.bf16.msra.mxu1 %v1052_v14 }
 0x109   :  { %v899_v18 = vpop.f32.mrf.mxu0 }
 0x10b   :  { %v921_v15 = vpop.f32.mrf.mxu1  ;;  %v900_v20 = vpop.f32.mrf.mxu0 }
 0x10c   :  { %v901_v26 = vadd.f32 %v900_v20, %v899_v18 }
 0x10d   :  { %v922_v16 = vpop.f32.mrf.mxu1  ;;  %v902_v23 = vpop.f32.mrf.mxu0 }
 0x10e   :  { %v522_v29 = vadd.f32 %v901_v26, %v814_v27  ;;  %v923_v30 = vadd.f32 %v922_v16, %v921_v15 }
 0x10f   :  { %v924_v17 = vpop.f32.mrf.mxu1  ;;  %v903_v28 = vpop.f32.mrf.mxu0 }
 0x110   :  { %v904_v31 = vadd.f32 %v903_v28, %v902_v23  ;;  %v563_v34 = vadd.f32 %v923_v30, %v522_v29 }
 0x111   :  { %v925_v19 = vpop.f32.mrf.mxu1 }
 0x112   :  { %v525_v35 = vadd.f32 %v904_v31, %v814_v27  ;;  %v926_v36 = vadd.f32 %v925_v19, %v924_v17 }
 0x113   :  { %v644_v21 = vpop.f32.mrf.mxu1 }
 0x114   :  { %v566_v41 = vadd.f32 %v926_v36, %v525_v35 }
 0x115   :  { %v964_v22 = vpop.f32.mrf.mxu1 }
 0x117   :  { %v647_v24 = vpop.f32.mrf.mxu1 }
 0x119   :  { %v965_v25 = vpop.f32.mrf.mxu1 }
 0x129   :  { %v943_v32 = vpop.f32.mrf.mxu0 }
 0x12b   :  { %v944_v33 = vpop.f32.mrf.mxu0 }
 0x12c   :  { %v945_v37 = vadd.f32 %v944_v33, %v943_v32 }
 0x12d   :  { %v946_v38 = vpop.f32.mrf.mxu0 }
 0x12e   :  { %v604_v39 = vadd.f32 %v945_v37, %v563_v34 }
 0x12f   :  { %v947_v40 = vpop.f32.mrf.mxu0 }
 0x130   :  { %v948_v42 = vadd.f32 %v947_v40, %v946_v38  ;;  %v645_v43 = vadd.f32 %v644_v21, %v604_v39 }
 0x132   :  { %v607_v44 = vadd.f32 %v948_v42, %v566_v41  ;;  %v651_v46 = vmax.f32 %v645_v43, 0.0 }
 0x134   :  { %v648_v45 = vadd.f32 %v647_v24, %v607_v44 }
 0x136   :  { %v652_v47 = vmax.f32 %v648_v45, 0.0 }
 0x138   :  { %v653_v48 = vpack.c.bf16 %v652_v47, %v651_v46 }
 0x13a   :  { %983 = vmatmul.mubr.bf16.vlgmr.msra.gmra.mxu1 %v653_v48 }
 0x1fa   :  { %v759_v50 = vpop.f32.mrf.mxu1 }
 0x1fb   :  { %v760_v51 = vadd.f32 %v865_v49, %v759_v50 }
 0x1fc   :  { %v984_v52 = vpop.f32.mrf.mxu1 }
 0x1fd   :  { %766 = vmax.xlane.f32.xlu0 %v760_v51 }
 0x1fe   :  { %v762_v53 = vpop.f32.mrf.mxu1 }
 0x1ff   :  { %v763_v54 = vadd.f32 %v865_v49, %v762_v53 }
 0x200   :  { %v985_v55 = vpop.f32.mrf.mxu1 }
 0x201   :  { %768 = vmax.xlane.f32.xlu0 %v763_v54 }
 0x286   :  { %v767_v56 = vpop.xlane.xlu0 %766 }
 0x287   :  { %v770_v57 = vsub.f32 %v760_v51, %v767_v56 }
 0x289   :  { %v772_v58 = vmul.f32 1.442695, %v770_v57 }
 0x28a   :  { %v769_v59 = vpop.xlane.xlu0 %768 }
 0x28b   :  { %v771_v60 = vsub.f32 %v763_v54, %v769_v59  ;;  %1053 = vpow2.f32 %v772_v58 }
 0x28d   :  { %v774_v61 = vmul.f32 1.442695, %v771_v60 }
 0x28f   :  { %1055 = vpow2.f32 %v774_v61 }
 0x298   :  { %v1054_v62 = vpop.eup %1053 }
 0x299   :  { %776 = vadd.xlane.f32.xlu1 %v1054_v62 }
 0x29c   :  { %v1056_v63 = vpop.eup %1055 }
 0x29d   :  { %778 = vadd.xlane.f32.xlu1 %v1056_v63 }
 0x322   :  { %v777_v0 = vpop.xlane.xlu1 %776 }
 0x323   :  { %1057 = vlog2.f32 %v777_v0 }
 0x326   :  { %v779_v1 = vpop.xlane.xlu1 %778 }
 0x327   :  { %1059 = vlog2.f32 %v779_v1 }
 0x330   :  { %v1058_v2 = vpop.eup %1057 }
 0x331   :  { %v781_v3 = vmul.f32 0.6931472, %v1058_v2 }
 0x333   :  { %v784_v7 = vsub.f32 %v770_v57, %v781_v3 }
 0x334   :  { %v1060_v4 = vpop.eup %1059 }
 0x335   :  { %v783_v5 = vmul.f32 0.6931472, %v1060_v4 }
 0x337   :  { %v785_v6 = vsub.f32 %v771_v60, %v783_v5 }
 0x339   :  { %v881_v8 = vpack.c.bf16 %v785_v6, %v784_v7 }
 0x33b   :  { %882 = vst [vmem:[#allocation8] sm:$0xff] %v881_v8  }
 0x33c   :  { %1132 = shalt.err (!%p1129_p5)
}
 0x33d   :  { %807 = dma.vmem_to_hbm [thread:$0]  %s802_s12, 128, %s1232_s5, [#allocation4], %s1148_s21, %s1148_s21, %s1149_s22  }
 0x33e   :  { %1145 = dma.done.wait [#allocation4], 128  }
 0x33f   :  { %1146 = vsyncadd [#allocation4], 4294967168 }
 0x340   :  { %811 = vsyncpa [#allocation3], 1 }
 0x341   :  { %812 = vsyncpa [#allocation6], 1 }
 0x342   :  { %813 = vsyncpa [#allocation4], 1 }

</bundles_post_ra>
